<compile_context>
chip_gen: v6e
topology: v6e:2x2x1
jax: 0.10.0
libtpu: 0.0.40
codegen_flags: <defaults>
</compile_context>

<pallas_src>
import functools

import jax
import jax.numpy as jnp
from jax.experimental import pallas as pl
from jax.experimental.pallas import tpu as pltpu

LANE = 128
SUB = 8            # sublanes per f32 vreg
BM_MAX = 2048      # rows per grid step (2048 x 128 f32 tile = 1 MiB per input)
NC = 2             # leading "parallel" grid axis (v7x megacore split)


def _dice_partial_kernel(x_ref, t_ref, out_ref, *, bm, nbh, m_valid, need_mask):
    """Accumulate per-(sublane,lane) partial sums of sigmoid(x)*t and sigmoid(x)+t.

    out_ref: (1, 2, 8, 128) f32 block, resident across the inner grid axis.
      [0,0]: intersection partials   sum(sigmoid(x) * t)
      [0,1]: denominator partials    sum(sigmoid(x) + t)
    """
    c = pl.program_id(0)
    i = pl.program_id(1)

    @pl.when(i == 0)
    def _init():
        out_ref[...] = jnp.zeros_like(out_ref)

    x = x_ref[...].astype(jnp.float32)   # (bm, 128)
    t = t_ref[...].astype(jnp.float32)   # (bm, 128)
    # sigmoid(x) == 0.5 * (tanh(0.5*x) + 1): one EUP op per element instead of two.
    s = 0.5 * (jnp.tanh(0.5 * x) + 1.0)

    st = s * t        # intersection term
    d = s + t         # combined denominator term

    if need_mask:
        # Logical block index (un-clamped); rows beyond m_valid are either the
        # ragged tail of the last block or the clamped overflow blocks of the
        # second grid half -- zero their contribution.
        b = c * nbh + i
        row = b * bm + jax.lax.broadcasted_iota(jnp.int32, (bm, 1), 0)
        valid = row < m_valid
        st = jnp.where(valid, st, 0.0)
        d = jnp.where(valid, d, 0.0)

    # (bm, 128) -> (bm//8, 8, 128); tile-aligned reshape, reducing the leading
    # axis is pure vreg+vreg VPU work (no cross-sublane XLU reduce, no masked
    # stores in the hot loop).
    out_ref[0, 0, :, :] += jnp.sum(st.reshape(bm // SUB, SUB, LANE), axis=0)
    out_ref[0, 1, :, :] += jnp.sum(d.reshape(bm // SUB, SUB, LANE), axis=0)


def dice_loss(inputs, targets, smooth=1.0):
    """JAX/Pallas equivalent of DiceLoss.forward(inputs, targets, smooth)."""
    x = inputs.reshape(-1)    # keep native dtype; cast happens per-tile in-kernel
    t = targets.reshape(-1)
    n = x.shape[0]

    align = SUB * LANE  # 1024
    if n % align != 0:
        # Only awkward sizes pay a pad copy (<= 1023 neutral elements).
        pad = align - (n % align)
        x = jnp.pad(x, (0, pad), constant_values=-1e9)  # sigmoid(-1e9) == 0 exactly
        t = jnp.pad(t, (0, pad), constant_values=0)

    m = x.shape[0] // LANE          # multiple of 8
    x2 = x.reshape(m, LANE)
    t2 = t.reshape(m, LANE)

    bm = min(BM_MAX, m)             # multiple of 8, <= m
    nb = pl.cdiv(m, bm)             # total row-blocks
    nbh = pl.cdiv(nb, NC)           # row-blocks per grid-half ("core")
    # Mask needed iff some logical rows in the covered space are not real rows
    # (ragged last block and/or overflow blocks in the second half).
    need_mask = (NC * nbh * bm != m)

    def in_map(c, i):
        # Clamp so overflow blocks of the second half read an in-bounds window;
        # their contribution is zeroed by the in-kernel row mask.
        return (jnp.minimum(c * nbh + i, nb - 1), 0)

    kernel = functools.partial(
        _dice_partial_kernel, bm=bm, nbh=nbh, m_valid=m, need_mask=need_mask
    )

    partials = pl.pallas_call(
        kernel,
        out_shape=jax.ShapeDtypeStruct((NC, 2, SUB, LANE), jnp.float32),
        grid_spec=pltpu.PrefetchScalarGridSpec(
            num_scalar_prefetch=0,
            grid=(NC, nbh),
            in_specs=[
                pl.BlockSpec((bm, LANE), in_map),
                pl.BlockSpec((bm, LANE), in_map),
            ],
            out_specs=pl.BlockSpec((1, 2, SUB, LANE), lambda c, i: (c, 0, 0, 0)),
        ),
        compiler_params=pltpu.CompilerParams(
            dimension_semantics=("parallel", "arbitrary"),
            vmem_limit_bytes=32 * 1024 * 1024,
        ),
    )(x2, t2)

    sums = partials.sum(axis=(0, 2, 3))   # (2,) tiny reduce in plain JAX
    intersection, denom_sum = sums[0], sums[1]

    dice = (2.0 * intersection + smooth) / (denom_sum + smooth)
    return 1.0 - dice


if __name__ == "__main__":
    key = jax.random.PRNGKey(0)
    k1, k2 = jax.random.split(key)

    # Small shapes consistent with a segmentation-style usage: (N, C, H, W)
    shape = (2, 4, 16, 16)
    inputs = jax.random.normal(k1, shape, dtype=jnp.float32)             # logits
    targets = jax.random.bernoulli(k2, 0.3, shape).astype(jnp.float32)   # binary mask

    loss = dice_loss(inputs, targets, smooth=1.0)
    loss = jax.block_until_ready(loss)

    # Pure-JAX reference check.
    xs = jax.nn.sigmoid(inputs).reshape(-1)
    ts = targets.reshape(-1)
    inter = (xs * ts).sum()
    ref = 1.0 - (2.0 * inter + 1.0) / (xs.sum() + ts.sum() + 1.0)
    assert jnp.allclose(loss, ref, rtol=1e-5, atol=1e-5), (loss, ref)

    print("KERNEL_OK")
</pallas_src>

<mosaic_0001>
module attributes {stable_mosaic.version = 11 : i64} {
  func.func @_dice_partial_kernel(%arg0: i32, %arg1: i32, %arg2: memref<16x128xf32, #tpu.memory_space<vmem>>, %arg3: memref<16x128xf32, #tpu.memory_space<vmem>>, %arg4: memref<1x2x8x128xf32, #tpu.memory_space<vmem>>) attributes {dimension_semantics = [#tpu.dimension_semantics<parallel>, #tpu.dimension_semantics<arbitrary>], iteration_bounds = array<i64: 2, 1>, scalar_prefetch = 0 : i64, scratch_operands = 0 : i64, tpu.core_type = #tpu.core_type<tc>, window_params = [{transform_indices = @transform_0, window_bounds = array<i64: 16, 128>}, {transform_indices = @transform_1, window_bounds = array<i64: 16, 128>}, {transform_indices = @transform_2, window_bounds = array<i64: 1, 2, 8, 128>}]} {
    %c0_i32 = arith.constant 0 : i32
    %0 = arith.cmpi eq, %arg1, %c0_i32 : i32
    %1 = arith.extui %0 : i1 to i32
    %c0_i32_0 = arith.constant 0 : i32
    %2 = arith.cmpi ne, %1, %c0_i32_0 : i32
    scf.if %2 {
      %cst_26 = arith.constant 0.000000e+00 : f32
      %46 = vector.broadcast %cst_26 : f32 to vector<1x2x8x128xf32>
      %c0_27 = arith.constant 0 : index
      %c0_28 = arith.constant 0 : index
      %c0_29 = arith.constant 0 : index
      %c0_30 = arith.constant 0 : index
      %47 = vector.load %arg4[%c0_27, %c0_28, %c0_29, %c0_30] : memref<1x2x8x128xf32, #tpu.memory_space<vmem>>, vector<1x2x8x128xf32>
      tpu.vector_store %arg4[%c0_27, %c0_28, %c0_29, %c0_30], %46 {strides = array<i32>} : memref<1x2x8x128xf32, #tpu.memory_space<vmem>>, vector<1x2x8x128xf32>,
    } else {
    }
    %c0 = arith.constant 0 : index
    %c0_1 = arith.constant 0 : index
    %3 = vector.load %arg2[%c0, %c0_1] : memref<16x128xf32, #tpu.memory_space<vmem>>, vector<16x128xf32>
    %c0_2 = arith.constant 0 : index
    %c0_3 = arith.constant 0 : index
    %4 = vector.load %arg3[%c0_2, %c0_3] : memref<16x128xf32, #tpu.memory_space<vmem>>, vector<16x128xf32>
    %cst = arith.constant 5.000000e-01 : f32
    %5 = vector.broadcast %cst : f32 to vector<16x128xf32>
    %6 = arith.mulf %5, %3 : vector<16x128xf32>
    %7 = math.tanh %6 : vector<16x128xf32>
    %cst_4 = arith.constant 1.000000e+00 : f32
    %8 = vector.broadcast %cst_4 : f32 to vector<16x128xf32>
    %9 = arith.addf %7, %8 : vector<16x128xf32>
    %cst_5 = arith.constant 5.000000e-01 : f32
    %10 = vector.broadcast %cst_5 : f32 to vector<16x128xf32>
    %11 = arith.mulf %10, %9 : vector<16x128xf32>
    %12 = arith.mulf %11, %4 : vector<16x128xf32>
    %13 = arith.addf %11, %4 : vector<16x128xf32>
    %c1_i32 = arith.constant 1 : i32
    %14 = arith.muli %arg0, %c1_i32 : i32
    %15 = arith.addi %14, %arg1 : i32
    %c16_i32 = arith.constant 16 : i32
    %16 = arith.muli %15, %c16_i32 : i32
    %17 = tpu.iota {dimensions = array<i32: 0>} : vector<16x1xi32>
    %18 = vector.broadcast %16 : i32 to vector<16x1xi32>
    %19 = arith.addi %18, %17 : vector<16x1xi32>
    %c16_i32_6 = arith.constant 16 : i32
    %20 = vector.broadcast %c16_i32_6 : i32 to vector<16x1xi32>
    %21 = arith.cmpi slt, %19, %20 : vector<16x1xi32>
    %cst_7 = arith.constant 0.000000e+00 : f32
    %22 = vector.shape_cast %21 : vector<16x1xi1> to vector<16x1xi1>
    %23 = vector.broadcast %22 : vector<16x1xi1> to vector<16x128xi1>
    %24 = vector.broadcast %cst_7 : f32 to vector<16x128xf32>
    %25 = arith.select %23, %12, %24 : vector<16x128xi1>, vector<16x128xf32>
    %cst_8 = arith.constant 0.000000e+00 : f32
    %26 = vector.shape_cast %21 : vector<16x1xi1> to vector<16x1xi1>
    %27 = vector.broadcast %26 : vector<16x1xi1> to vector<16x128xi1>
    %28 = vector.broadcast %cst_8 : f32 to vector<16x128xf32>
    %29 = arith.select %27, %13, %28 : vector<16x128xi1>, vector<16x128xf32>
    %c0_9 = arith.constant 0 : index
    %c0_10 = arith.constant 0 : index
    %c0_11 = arith.constant 0 : index
    %c0_12 = arith.constant 0 : index
    %30 = vector.load %arg4[%c0_9, %c0_10, %c0_11, %c0_12] : memref<1x2x8x128xf32, #tpu.memory_space<vmem>>, vector<1x1x8x128xf32>
    %31 = vector.shape_cast %30 : vector<1x1x8x128xf32> to vector<8x128xf32>
    %32 = vector.shape_cast %25 : vector<16x128xf32> to vector<2x8x128xf32>
    %cst_13 = arith.constant dense<0.000000e+00> : vector<8x128xf32>
    %33 = vector.multi_reduction <add>, %32, %cst_13 [0] : vector<2x8x128xf32> to vector<8x128xf32>
    %34 = arith.addf %31, %33 : vector<8x128xf32>
    %c0_14 = arith.constant 0 : index
    %c0_15 = arith.constant 0 : index
    %c0_16 = arith.constant 0 : index
    %c0_17 = arith.constant 0 : index
    %35 = vector.load %arg4[%c0_14, %c0_15, %c0_16, %c0_17] : memref<1x2x8x128xf32, #tpu.memory_space<vmem>>, vector<1x1x8x128xf32>
    %36 = vector.shape_cast %35 : vector<1x1x8x128xf32> to vector<8x128xf32>
    %37 = vector.shape_cast %34 : vector<8x128xf32> to vector<1x1x8x128xf32>
    tpu.vector_store %arg4[%c0_14, %c0_15, %c0_16, %c0_17], %37 {strides = array<i32>} : memref<1x2x8x128xf32, #tpu.memory_space<vmem>>, vector<1x1x8x128xf32>,
    %c0_18 = arith.constant 0 : index
    %c1 = arith.constant 1 : index
    %c0_19 = arith.constant 0 : index
    %c0_20 = arith.constant 0 : index
    %38 = vector.load %arg4[%c0_18, %c1, %c0_19, %c0_20] : memref<1x2x8x128xf32, #tpu.memory_space<vmem>>, vector<1x1x8x128xf32>
    %39 = vector.shape_cast %38 : vector<1x1x8x128xf32> to vector<8x128xf32>
    %40 = vector.shape_cast %29 : vector<16x128xf32> to vector<2x8x128xf32>
    %cst_21 = arith.constant dense<0.000000e+00> : vector<8x128xf32>
    %41 = vector.multi_reduction <add>, %40, %cst_21 [0] : vector<2x8x128xf32> to vector<8x128xf32>
    %42 = arith.addf %39, %41 : vector<8x128xf32>
    %c0_22 = arith.constant 0 : index
    %c1_23 = arith.constant 1 : index
    %c0_24 = arith.constant 0 : index
    %c0_25 = arith.constant 0 : index
    %43 = vector.load %arg4[%c0_22, %c1_23, %c0_24, %c0_25] : memref<1x2x8x128xf32, #tpu.memory_space<vmem>>, vector<1x1x8x128xf32>
    %44 = vector.shape_cast %43 : vector<1x1x8x128xf32> to vector<8x128xf32>
    %45 = vector.shape_cast %42 : vector<8x128xf32> to vector<1x1x8x128xf32>
    tpu.vector_store %arg4[%c0_22, %c1_23, %c0_24, %c0_25], %45 {strides = array<i32>} : memref<1x2x8x128xf32, #tpu.memory_space<vmem>>, vector<1x1x8x128xf32>,
    return
  }
  func.func @transform_0(%arg0: i32, %arg1: i32) -> (i32, i32) {
    %c1_i32 = arith.constant 1 : i32
    %0 = arith.muli %arg0, %c1_i32 : i32
    %1 = arith.addi %0, %arg1 : i32
    %c0_i32 = arith.constant 0 : i32
    %2 = arith.minsi %1, %c0_i32 : i32
    %c0_i32_0 = arith.constant 0 : i32
    %c0_i32_1 = arith.constant 0 : i32
    return %2, %c0_i32_0 : i32, i32
  }
  func.func @transform_1(%arg0: i32, %arg1: i32) -> (i32, i32) {
    %c1_i32 = arith.constant 1 : i32
    %0 = arith.muli %arg0, %c1_i32 : i32
    %1 = arith.addi %0, %arg1 : i32
    %c0_i32 = arith.constant 0 : i32
    %2 = arith.minsi %1, %c0_i32 : i32
    %c0_i32_0 = arith.constant 0 : i32
    %c0_i32_1 = arith.constant 0 : i32
    return %2, %c0_i32_0 : i32, i32
  }
  func.func @transform_2(%arg0: i32, %arg1: i32) -> (i32, i32, i32, i32) {
    %c0_i32 = arith.constant 0 : i32
    %c0_i32_0 = arith.constant 0 : i32
    %c0_i32_1 = arith.constant 0 : i32
    %c0_i32_2 = arith.constant 0 : i32
    return %arg0, %c0_i32, %c0_i32_0, %c0_i32_1 : i32, i32, i32, i32
  }
}

</mosaic_0001>

<bundles_post_ra>
// kernel: tpu_custom_call.1
= control target key start
LH: loop header
LB: loop body
LE: loop exit
PB: predicated region body
PF: predicated region fallthrough
CT: control target
= control target key end

     0   :  { %7 = vsyncpa [#allocation3], 0  ;;  %s915_s0 = inlined_call_operand.hbm [shape: f32[16,128], index: 0, kind: input, shape index: {}]   ;;  %s916_s1 = inlined_call_operand.hbm [shape: f32[16,128], index: 1, kind: input, shape index: {}]   ;;  %s917_s2 = inlined_call_operand.hbm [shape: f32[2,2,8,128], index: 2, kind: output, shape index: {}]  }
   0x1   :  { %9 = vsyncpa [#allocation3 + $0x1], 0 }
   0x2   :  { %10 = vsyncpa [#allocation6], 0 }
   0x3   :  { %12 = vsyncpa [#allocation6 + $0x1], 0 }
   0x4   :  { %13 = vsyncpa [#allocation4], 0 }
   0x5   :  { %15 = vsyncpa [#allocation4 + $0x1], 0  ;;  %s717_s9 = smov 0   ;;  %s719_s10 = smov 0  }
   0x6   :  { %s721_s11 = smov 0   ;;  %s723_s12 = smov 0  }
   0x7   :  { %s725_s13 = smov 0   ;;  %s727_s14 = smov 0  }
   0x8   :  { %s729_s15 = smov 0   ;;  %s731_s16 = smov 0  }
   0x9 LB: > { %s407_s17 = sadd.s32 4294967295, %s693_s16   ;;  %s408_s18 = sadd.s32 4294967294, %s693_s16   ;;  %s693_s16 = sphi %s731_s16, %s21_s16   ;;  %s689_s15 = sphi %s729_s15, %s936_s15   ;;  %s685_s14 = sphi %s727_s14, %s935_s14   ;;  %s681_s13 = sphi %s725_s13, %s905_s13   ;;  %s677_s12 = sphi %s723_s12, %s934_s12   ;;  %s673_s11 = sphi %s721_s11, %s933_s11   ;;  %s669_s10 = sphi %s719_s10, %s932_s10   ;;  %s665_s9 = sphi %s717_s9, %s931_s9  }
   0xa   : > { %s33_s19 = sadd.s32 1, %s689_s15  ;;  %p662_p1 = scmp.ne.s32.totalorder %s681_s13, 0 }
   0xb   : > { %p35_p0 = scmp.ge.s32.totalorder %s33_s19, 2  ;;  %p54_p2 = scmp.eq.s32.totalorder %s693_s16, 0 }
   0xc   : > { %p59_p3 = scmp.ne.s32.totalorder %s681_s13, %s677_s12  ;;  %p60_p5 = scmp.eq.s32.totalorder %s407_s17, 0 }
   0xd   : > { %s938_s19 = smov (%p35_p0, %s33_s19), 0  ;;  %p763_p4 = por %p662_p1, %p54_p2 }
   0xe   : > { %p767_p6 = por %p60_p5, %p59_p3  ;;  %s101_s22 = ssub.s32 %s689_s15, %s938_s19 }
   0xf   : > { %p102_p7 = scmp.eq.s32.totalorder %s101_s22, 0  ;;  %s104_s23 = sadd.s32 1, %s673_s11 }
  0x10   : > { %s921_s21 = scalar_select %p767_p6, 1, 0 }
  0x11   : > { %s775_s24 = scalar_select %p102_p7, %s673_s11, %s104_s23  }
  0x12   : > { %p114_p8 = scmp.ne.s32.totalorder %s673_s11, %s669_s10  ;;  %p115_p9 = scmp.eq.s32.totalorder %s407_s17, 1 }
  0x13   : > { %p120_p10 = scmp.ne.s32.totalorder %s669_s10, %s665_s9  ;;  %p121_p11 = scmp.eq.s32.totalorder %s408_s18, 1 }
  0x14   : > { %p781_p12 = por %p115_p9, %p114_p8  ;;  %p449_p1 = scmp.lt.s32.totalorder %s693_s16, 2 }
  0x15   : > { %p786_p0 = por %p121_p11, %p120_p10  ;;  %s695_s27 = smov [#allocation2]  }
  0x16   : > { %s922_s25 = scalar_select %p781_p12, 1, 0 }
  0x17   : > { %s923_s26 = scalar_select %p786_p0, 1, 0 }
  0x18   : > { %s155_s28 = sshll.u32 %s695_s27, 4  ;;  %p793_p2 = pnand %p449_p1, %p763_p4  ;;  %s156_s28 = int_to_ptr.vmem [resolvable:$true] %s155_s28 }
  0x19   : > { %s532_s4 = scalar_lea.hbm %s915_s0, 256 }
  0x1a   : > { %p533_p3 = scmp.ne.s32.totalorder %s915_s0, %s532_s4  ;;  %p534_p5 = pneg %p793_p2 }
  0x1b   : > { %p539_p8 = scmp.lt.s32.totalorder %s532_s4, %s532_s4 }
  0x1c   : > { %p535_p7 = pnand %p534_p5, %p533_p3 }
  0x1e   : > { %p536_p4 = pneg %p535_p7 }
  0x20   : > { %p541_p9 = pnand %p539_p8, %p536_p4 }
  0x22   : > { %544 = shalt.err (!%p541_p9)
}
  0x23   : > { %s545_s7 = scalar_lea.vmem %s156_s28, 256  ;;  %s552_s8 = scalar_lea.vmem %s156_s28, 512 }
  0x24   : > { %p546_p10 = scmp.ne.s32.totalorder %s156_s28, %s545_s7  ;;  %p553_p13 = scmp.lt.s32.totalorder %s156_s28, %s156_s28 }
  0x25   : > { %p554_p0 = scmp.lt.s32.totalorder %s552_s8, %s545_s7 }
  0x26   : > { %p548_p11 = pnand %p546_p10, %p534_p5 }
  0x27   : > { %p555_p12 = por %p554_p0, %p553_p13 }
  0x28   : > { %p549_p1 = pneg %p548_p11 }
  0x2a   : > { %p556_p6 = pnand %p555_p12, %p549_p1 }
  0x2c   : > { %559 = shalt.err (!%p556_p6)
}
  0x2d   : > { %s696_s12 = smov 128   ;;  %s697_s17 = smov 8  }
  0x2e   : > { %441 = dma.hbm_to_vmem [thread:$0]  (!%p793_p2), %s915_s0, 256, %s156_s28, [#allocation3], %s696_s12, %s696_s12, %s697_s17  }
  0x2f   : > { %p417_p3 = scmp.ge.s32.totalorder %s693_s16, 1  ;;  %p187_p7 = scmp.lt.s32.totalorder %s693_s16, 3 }
  0x30   : > { %s698_s23 = smov [#allocation5]   ;;  %s560_s4 = scalar_lea.hbm %s916_s1, 256 }
  0x31   : > { %p818_p4 = pnand %p417_p3, %p187_p7  ;;  %s179_s27 = sshll.u32 %s698_s23, 4  ;;  %s180_s27 = int_to_ptr.vmem [resolvable:$true] %s179_s27 }
  0x32   : > { %p561_p6 = scmp.ne.s32.totalorder %s916_s1, %s560_s4  ;;  %p567_p0 = scmp.lt.s32.totalorder %s560_s4, %s560_s4 }
  0x33   : > { %s925_s22 = scalar_select %p818_p4, 1, 0 }
  0x34   : > { %p563_p12 = pnand %p561_p6, %p534_p5 }
  0x36   : > { %p564_p13 = pneg %p563_p12 }
  0x38   : > { %p569_p8 = pnand %p567_p0, %p564_p13 }
  0x3a   : > { %572 = shalt.err (!%p569_p8)
}
  0x3b   : > { %s573_s28 = scalar_lea.vmem %s180_s27, 256  ;;  %s580_s7 = scalar_lea.vmem %s180_s27, 512 }
  0x3c   : > { %p574_p9 = scmp.ne.s32.totalorder %s180_s27, %s573_s28  ;;  %p581_p1 = scmp.lt.s32.totalorder %s180_s27, %s180_s27 }
  0x3d   : > { %p582_p3 = scmp.lt.s32.totalorder %s580_s7, %s573_s28 }
  0x3e   : > { %p576_p10 = pnand %p574_p9, %p534_p5 }
  0x3f   : > { %p583_p7 = por %p582_p3, %p581_p1 }
  0x40   : > { %p577_p11 = pneg %p576_p10 }
  0x42   : > { %p584_p4 = pnand %p583_p7, %p577_p11 }
  0x44   : > { %587 = shalt.err (!%p584_p4)
}
  0x45   : > { %444 = dma.hbm_to_vmem [thread:$0]  (!%p793_p2), %s916_s1, 256, %s180_s27, [#allocation6], %s696_s12, %s696_s12, %s697_s17  }
  0x46   : > { %p926_p6 = scmp.ne.s32.totalorder %s925_s22, 0 }
  0x47   : > { %s193_s20 = sand.u32 (!%p926_p6), 1, %s681_s13   ;;  %p927_p5 = scmp.ne.s32.totalorder (!%p926_p6), %s921_s21, 0 }
  0x48   : > { %191 = sbr.rel (%p926_p6) target bundleno = 121 (0x79), region = 28  ;;  %s418_s23 = sshll.u32 (!%p926_p6), %s193_s20, 4 }
  0x49   : > { %s194_s30 = scalar_lea.sflag (!%p926_p6), [#allocation3], %s193_s20  ;;  %s197_s3 = scalar_lea.vmem (!%p926_p6), [#allocation2], %s418_s23 }
  0x4d   : > { %651 = dma.done.wait (%p927_p5), %s194_s30, 256  }
  0x4e   : > { %653 = vsyncadd (%p927_p5), %s194_s30, 4294967040  ;;  %s203_s29 = scalar_lea.sflag [#allocation6], %s193_s20  ;;  %s206_s4 = scalar_lea.vmem [#allocation5], %s418_s23 }
  0x4f   : > { %655 = dma.done.wait (%p927_p5), %s203_s29, 256  }
  0x50   : > { %657 = vsyncadd (%p927_p5), %s203_s29, 4294967040  ;;  %v246_v0 = vld [vmem:[%s197_s3] sm:$0xff]  ;;  %v247_v1 = vld [vmem:[%s197_s3 + $0x8] sm:$0xff]  ;;  %v264_v4 = vlaneseq  ;;  %s421_s12 = sshll.u32 %s685_s14, 4  ;;  %s229_s17 = sand.u32 1, %s669_s10  }
  0x51   : > { %v250_v2 = vmul.f32 0.5, %v246_v0  ;;  %v251_v3 = vmul.f32 0.5, %v247_v1  ;;  %v267_v7 = vstv %s421_s12  ;;  %s420_s21 = sshll.u32 %s229_s17, 4  ;;  %v248_v13 = vld [vmem:[%s206_s4] sm:$0xff]  ;;  %v249_v15 = vld [vmem:[%s206_s4 + $0x8] sm:$0xff]  ;;  %s431_s22 = sshll.u32 %s685_s14, 8 }
  0x52   : > { %v265_v5 = vshrl.u32 %v264_v4, 7  ;;  %s231_s27 = scalar_lea.vmem [#allocation7], %s420_s21  ;;  %s858_s7 = scalar_lea.hbm %s917_s2, %s431_s22 }
  0x53   : > { %528 = vtanh.f32 %v250_v2  ;;  %s303_s5 = sshll.u32 %s231_s27, 4  ;;  %s864_s14 = scalar_lea.sflag [#allocation4], %s229_s17  ;;  %s860_s5 = int_to_ptr.vmem [resolvable:$true] %s303_s5 }
  0x54   : > { %530 = vtanh.f32 %v251_v3  ;;  %v266_v6 = vadd.s32 8, %v265_v5  ;;  %v268_v9 = vadd.s32 %v267_v7, %v265_v5  ;;  %s588_s8 = scalar_lea.vmem %s860_s5, 256  ;;  %p928_p4 = scmp.ne.s32.totalorder %s922_s25, 0 }
  0x55   : > { %p589_p2 = scmp.ne.s32.totalorder %s860_s5, %s588_s8  ;;  %s699_s18 = smov [#allocation7]  }
  0x56   : > { %v269_v12 = vadd.s32 %v267_v7, %v266_v6  ;;  %vm270_vm0 = vcmp.lt.s32.totalorder %v268_v9, 16  ;;  %s592_s20 = sshll.u32 %s699_s18, 4  ;;  %s593_s20 = int_to_ptr.vmem [resolvable:$false] %s592_s20 }
  0x57   : > { %p590_p12 = pnand %p589_p2, %p928_p4  ;;  %s594_s23 = scalar_lea.vmem %s593_s20, 512 }
  0x58   : > { %vm271_vm1 = vcmp.lt.s32.totalorder %v269_v12, 16  ;;  %p595_p0 = scmp.lt.s32.totalorder %s860_s5, %s593_s20  ;;  %p596_p8 = scmp.lt.s32.totalorder %s594_s23, %s588_s8 }
  0x59   : > { %p591_p13 = pneg %p590_p12 }
  0x5a   : > { %p597_p9 = por %p596_p8, %p595_p0 }
  0x5c   : > { %p598_p10 = pnand %p597_p9, %p591_p13 }
  0x60   : > { %v529_v8 = vpop.eup %528 }
  0x61   : > { %v531_v10 = vpop.eup %530  ;;  %v254_v11 = vadd.f32 1.0, %v529_v8 }
  0x62   : > { %v255_v14 = vadd.f32 1.0, %v531_v10 }
  0x63   : > { %v256_v16 = vmul.f32 0.5, %v254_v11 }
  0x64   : > { %v257_v17 = vmul.f32 0.5, %v255_v14 }
  0x65   : > { %v258_v18 = vmul.f32 %v256_v16, %v248_v13  ;;  %v260_v19 = vadd.f32 %v256_v16, %v248_v13 }
  0x66   : > { %v259_v20 = vmul.f32 %v257_v17, %v249_v15  ;;  %v261_v21 = vadd.f32 %v257_v17, %v249_v15 }
  0x67   : > { %v276_v22 = vsel %vm270_vm0, %v258_v18, 0.0  ;;  %v278_v23 = vsel %vm270_vm0, %v260_v19, 0.0 }
  0x68   : > { %v277_v24 = vsel %vm271_vm1, %v259_v20, 0.0  ;;  %v279_v25 = vsel %vm271_vm1, %v261_v21, 0.0 }
  0x69   : > { %v281_v26 = vadd.f32 %v277_v24, %v276_v22  ;;  %v286_v27 = vadd.f32 %v279_v25, %v278_v23 }
  0x6b   : > { %283 = vst [vmem:[%s231_s27] sm:$0xff] %v281_v26  ;;  %423 = vst [vmem:[%s231_s27 + $0x8] sm:$0xff] %v286_v27 }
  0x6c   : > { %601 = shalt.err (!%p598_p10)
}
  0x6d   : > { %s602_s30 = scalar_lea.hbm %s858_s7, 256  ;;  %s606_s4 = scalar_lea.hbm %s917_s2, 512 }
  0x6e   : > { %p603_p11 = scmp.ne.s32.totalorder %s858_s7, %s602_s30  ;;  %p607_p7 = scmp.lt.s32.totalorder %s858_s7, %s917_s2 }
  0x6f   : > { %p608_p6 = scmp.lt.s32.totalorder %s606_s4, %s602_s30 }
  0x70   : > { %p604_p1 = pnand %p603_p11, %p928_p4 }
  0x71   : > { %p609_p5 = por %p608_p6, %p607_p7 }
  0x72   : > { %p605_p3 = pneg %p604_p1 }
  0x74   : > { %p610_p2 = pnand %p609_p5, %p605_p3 }
  0x76   : > { %613 = shalt.err (!%p610_p2)
}
  0x77   : > { %s700_s21 = smov 128   ;;  %s701_s22 = smov 8  }
  0x78   : > { %436 = dma.vmem_to_hbm [thread:$0]  (%p928_p4), %s860_s5, 256, %s858_s7, %s864_s14, %s700_s21, %s700_s21, %s701_s22  }
  0x79 PF: > { %s318_s27 = sand.u32 1, %s665_s9   ;;  %p929_p12 = scmp.ne.s32.totalorder %s923_s26, 0 }
  0x7a   : > { %p930_p13 = scmp.ge.s32.totalorder %s693_s16, 2  ;;  %s319_s6 = scalar_lea.sflag [#allocation4], %s318_s27 }
  0x7c   : > { %p446_p0 = pnand %p930_p13, %p929_p12 }
  0x7e   : > { %p447_p8 = pneg %p446_p0 }
  0x80   : > { %659 = dma.done.wait (%p447_p8), %s319_s6, 256  }
  0x81   : > { %661 = vsyncadd (%p447_p8), %s319_s6, 4294967040  ;;  %s21_s16 = sadd.s32 1, %s693_s16   ;;  %s931_s9 = smov %s669_s10 }
  0x82   : > { %p18_p9 = scmp.ge.s32.totalorder %s21_s16, 4   ;;  %s932_s10 = smov %s673_s11 }
  0x83   : > { %s933_s11 = smov %s775_s24  ;;  %s934_s12 = smov %s681_s13 }
  0x84   : > { %s905_s13 = smov 0   ;;  %s935_s14 = smov %s689_s15 }
  0x85   : > { %s936_s15 = smov %s938_s19  ;;  %20 = sbr.rel (!%p18_p9) target bundleno = 9 (0x9), region = 91 }
  0x8a   :  { %324 = vsyncpa [#allocation3], 1 }
  0x8b   :  { %326 = vsyncpa [#allocation3 + $0x1], 1 }
  0x8c   :  { %327 = vsyncpa [#allocation6], 1 }
  0x8d   :  { %329 = vsyncpa [#allocation6 + $0x1], 1 }
  0x8e   :  { %330 = vsyncpa [#allocation4], 1 }
  0x8f   :  { %332 = vsyncpa [#allocation4 + $0x1], 1 }

</bundles_post_ra>
